<compile_context>
chip_gen: v6e
topology: v6e:2x2x1
jax: 0.10.0
libtpu: 0.0.40
codegen_flags: <defaults>
</compile_context>

<pallas_src>
import functools

import numpy as np
import jax
import jax.numpy as jnp
from jax.experimental import pallas as pl
from jax.experimental.pallas import tpu as pltpu

EPS = 1e-5  # PyTorch BatchNorm2d default


# ------------------------------ param folding --------------------------------

def fold_bn(bn):
    gamma, beta, mean, var = bn
    scale = gamma / jnp.sqrt(var + EPS)
    bias = beta - mean * scale
    return scale, bias


def _tap_weights(w, w_in, w_out, stride, pad):
    """Fold a conv's horizontal taps, width stride and width zero-padding into
    per-vertical-tap matmul matrices over the UNpadded width.

    Input row slabs are (rows, w_in*Cin) (NHWC rows, lane = j*Cin + ci).
    Returns mats (KH, w_in*Cin, w_out*Cout) such that
        conv_out[io, jo*Cout + co] = sum_kh  x_kh[io, :] @ mats[kh]
    where x_kh is the activated input row slab for vertical tap kh.
    Horizontal taps that fall into the width zero-padding are simply dropped
    (their selection entry stays 0), so no physical padding is ever built.
    """
    cout, cin, kh_sz, kw_sz = w.shape
    sel = np.zeros((kw_sz, w_out, w_in), np.float32)
    for kw in range(kw_sz):
        for jo in range(w_out):
            j = stride * jo + kw - pad
            if 0 <= j < w_in:
                sel[kw, jo, j] = 1.0
    # mats[h, i, c, j, o] = sum_k sel[k, j, i] * w[o, c, h, k]
    mats = jnp.einsum('kji,ochk->hicjo', jnp.asarray(sel), w)
    return mats.reshape(kh_sz, w_in * cin, w_out * cout)


def _images_per_step(n_images, ho):
    """Images per grid step: aim for 128-512 MXU rows per step while keeping
    at least 2 grid steps (v7x has 2 TensorCores)."""
    target = max(1, min(n_images // 2 if n_images > 1 else 1, 256 // ho))
    for cand in range(target, 0, -1):
        if n_images % cand == 0:
            return cand
    return 1


# ------------------------------ fused forward ---------------------------------

@functools.partial(jax.jit, static_argnames=("stride",))
def residual_block_forward(x_nchw, params, *, stride=2):
    N, Cin, H, W = x_nchw.shape
    Cout = params['conv1_w'].shape[0]
    assert stride == 2 and H % 2 == 0 and W % 2 == 0
    Ho, Wo = H // stride, W // stride
    Lin, Lout = W * Cin, Wo * Cout

    B = _images_per_step(N, Ho)          # images per grid step
    M = B * Ho                           # matmul rows per grid step
    n_steps = N // B

    # ---- tiny one-time prep outside the kernel (no activation expansion) ----
    # Even rows feed the conv1 center tap (and the stride-2 shortcut); odd rows
    # feed the top/bottom taps.  This is one cheap XLA shuffle of an 8 KiB input.
    x_nhwc = jnp.transpose(x_nchw, (0, 2, 3, 1))
    x_even = x_nhwc[:, 0::2].reshape(N * Ho, Lin)
    x_odd = x_nhwc[:, 1::2].reshape(N * Ho, Lin)

    # conv1 tap matrices with the 1x1 shortcut fused onto the lanes:
    # each (Lin, 2*Lout) matrix produces [conv1_tap | shortcut_tap] in one dot.
    w1 = _tap_weights(params['conv1_w'], W, Wo, stride, 1)          # (3, Lin, Lout)
    wsc = _tap_weights(params['conv_sc_w'], W, Wo, stride, 0)[0]    # (Lin, Lout)
    zsc = jnp.zeros_like(wsc)
    w1cat = jnp.stack([jnp.concatenate([w1[0], zsc], axis=1),
                       jnp.concatenate([w1[1], wsc], axis=1),
                       jnp.concatenate([w1[2], zsc], axis=1)],
                      axis=0).astype(jnp.bfloat16)                  # (3, Lin, 2*Lout)
    w2m = _tap_weights(params['conv2_w'], Wo, Wo, 1, 1).astype(jnp.bfloat16)

    s0, b0 = fold_bn(params['bn0'])
    s1, b1 = fold_bn(params['bn1'])
    s2, b2 = fold_bn(params['bn2'])
    ssc, bsc = fold_bn(params['bn_sc'])
    bn0v = jnp.stack([jnp.tile(s0, W), jnp.tile(b0, W)], 0).astype(jnp.float32)
    bnc1 = jnp.stack([jnp.concatenate([jnp.tile(s1, Wo), jnp.tile(ssc, Wo)]),
                      jnp.concatenate([jnp.tile(b1, Wo), jnp.tile(bsc, Wo)])],
                     0).astype(jnp.float32)                         # (2, 2*Lout)
    bnc2 = jnp.stack([jnp.tile(s2, Wo), jnp.tile(b2, Wo)], 0).astype(jnp.float32)

    def kernel(xe_ref, xo_ref, w1_ref, w2_ref, bn0_ref, bnc1_ref, bnc2_ref, o_ref):
        s0_, b0_ = bn0_ref[0:1, :], bn0_ref[1:2, :]
        sc1_, bc1_ = bnc1_ref[0:1, :], bnc1_ref[1:2, :]
        s2_, b2_ = bnc2_ref[0:1, :], bnc2_ref[1:2, :]

        # Per-image row masks for the +-1 row shifts inside the batched slab.
        row = jax.lax.broadcasted_iota(jnp.int32, (M, 1), 0)
        has_prev = (row % Ho) != 0          # row has a row above it in its image
        has_next = (row % Ho) != (Ho - 1)   # row has a row below it in its image

        # bn0 + ReLU (f32 VPU), feeding both conv1 and the shortcut.
        a_even = jnp.maximum(xe_ref[...] * s0_ + b0_, 0.0)   # conv1 center tap (kh=1)
        a_odd = jnp.maximum(xo_ref[...] * s0_ + b0_, 0.0)    # conv1 bottom tap (kh=2)
        # conv1 top tap (kh=0): odd rows shifted down one output row; the first
        # output row of each image sees the zero vertical padding instead.
        a_top = jnp.where(has_prev, pltpu.roll(a_odd, 1, axis=0), 0.0)

        a_top_b = a_top.astype(jnp.bfloat16)
        a_even_b = a_even.astype(jnp.bfloat16)
        a_odd_b = a_odd.astype(jnp.bfloat16)

        # conv1 (3x3, s2) + fused 1x1 s2 shortcut: three MXU dots, each 128
        # output lanes = [conv1 tap | shortcut tap]; f32 accumulation.
        c1 = (jnp.dot(a_top_b, w1_ref[0], preferred_element_type=jnp.float32) +
              jnp.dot(a_even_b, w1_ref[1], preferred_element_type=jnp.float32) +
              jnp.dot(a_odd_b, w1_ref[2], preferred_element_type=jnp.float32))
        t = c1 * sc1_ + bc1_                      # [bn1 | bn_sc] affine, one VPU pass
        y1 = jnp.maximum(t[:, :Lout], 0.0)        # conv1 branch: + ReLU
        sc = t[:, Lout:]                          # shortcut branch: no ReLU

        # conv2 (3x3, s1) on the in-register y1 slab (vertical taps via roll).
        y_ctr = y1.astype(jnp.bfloat16)
        y_top = jnp.where(has_prev, pltpu.roll(y1, 1, axis=0), 0.0).astype(jnp.bfloat16)
        y_bot = jnp.where(has_next, pltpu.roll(y1, M - 1, axis=0), 0.0).astype(jnp.bfloat16)
        c2 = (jnp.dot(y_top, w2_ref[0], preferred_element_type=jnp.float32) +
              jnp.dot(y_ctr, w2_ref[1], preferred_element_type=jnp.float32) +
              jnp.dot(y_bot, w2_ref[2], preferred_element_type=jnp.float32))

        # bn2 + ReLU + residual add; f32 epilogue, single store.
        o_ref[...] = (jnp.maximum(c2 * s2_ + b2_, 0.0) + sc).astype(o_ref.dtype)

    out_slab = pl.pallas_call(
        kernel,
        out_shape=jax.ShapeDtypeStruct((N * Ho, Lout), jnp.float32),
        grid=(n_steps,),
        in_specs=[
            pl.BlockSpec((M, Lin), lambda n: (n, 0)),                # even input rows
            pl.BlockSpec((M, Lin), lambda n: (n, 0)),                # odd input rows
            pl.BlockSpec((3, Lin, 2 * Lout), lambda n: (0, 0, 0)),   # conv1+shortcut mats
            pl.BlockSpec((3, Lout, Lout), lambda n: (0, 0, 0)),      # conv2 mats
            pl.BlockSpec((2, Lin), lambda n: (0, 0)),                # bn0 scale/bias
            pl.BlockSpec((2, 2 * Lout), lambda n: (0, 0)),           # bn1|bn_sc scale/bias
            pl.BlockSpec((2, Lout), lambda n: (0, 0)),               # bn2 scale/bias
        ],
        out_specs=pl.BlockSpec((M, Lout), lambda n: (n, 0)),
        compiler_params=pltpu.CompilerParams(
            dimension_semantics=("parallel",)),
    )(x_even, x_odd, w1cat, w2m, bn0v, bnc1, bnc2)

    out = out_slab.reshape(N, Ho, Wo, Cout)
    return jnp.transpose(out, (0, 3, 1, 2))                # NHWC -> NCHW


# --------------------------- pure-JAX reference -------------------------------

@functools.partial(jax.jit, static_argnames=("stride",))
def reference_forward(x_nchw, params, *, stride=2):
    def bn(x, p):
        gamma, beta, mean, var = p
        return (x - mean) / jnp.sqrt(var + EPS) * gamma + beta

    def conv(x, w, stride, pad):
        return jax.lax.conv_general_dilated(
            x, jnp.transpose(w, (2, 3, 1, 0)),
            window_strides=(stride, stride),
            padding=((pad, pad), (pad, pad)),
            dimension_numbers=('NHWC', 'HWIO', 'NHWC'),
            precision=jax.lax.Precision.HIGHEST)

    x = jnp.transpose(x_nchw, (0, 2, 3, 1))
    Cin = x.shape[-1]
    Cout = params['conv1_w'].shape[0]
    x1 = jax.nn.relu(bn(x, params['bn0']))
    if stride != 1 or Cin != Cout:
        sc = bn(conv(x1, params['conv_sc_w'], stride, 0), params['bn_sc'])
    else:
        sc = x
    y = jax.nn.relu(bn(conv(x1, params['conv1_w'], stride, 1), params['bn1']))
    y = jax.nn.relu(bn(conv(y, params['conv2_w'], 1, 1), params['bn2']))
    out = y + sc
    return jnp.transpose(out, (0, 3, 1, 2))


# --------------------------------- main ---------------------------------------

def make_params(key, in_planes, out_planes):
    ks = jax.random.split(key, 8)

    def bn_params(k, c):
        k1, k2, k3, k4 = jax.random.split(k, 4)
        gamma = 1.0 + 0.1 * jax.random.normal(k1, (c,), jnp.float32)
        beta = 0.1 * jax.random.normal(k2, (c,), jnp.float32)
        mean = 0.1 * jax.random.normal(k3, (c,), jnp.float32)
        var = jax.random.uniform(k4, (c,), jnp.float32, 0.5, 1.5)
        return (gamma, beta, mean, var)

    def conv_w(k, cout, cin, ksz):
        fan_in = cin * ksz * ksz
        return (jax.random.normal(k, (cout, cin, ksz, ksz), jnp.float32)
                * jnp.sqrt(2.0 / fan_in))

    return {
        'bn0': bn_params(ks[0], in_planes),
        'conv1_w': conv_w(ks[1], out_planes, in_planes, 3),
        'bn1': bn_params(ks[2], out_planes),
        'conv2_w': conv_w(ks[3], out_planes, out_planes, 3),
        'bn2': bn_params(ks[4], out_planes),
        'conv_sc_w': conv_w(ks[5], out_planes, in_planes, 1),
        'bn_sc': bn_params(ks[6], out_planes),
    }


if __name__ == "__main__":
    in_planes, out_planes, stride = 4, 8, 2
    key = jax.random.PRNGKey(0)
    k_params, k_x = jax.random.split(key)
    params = make_params(k_params, in_planes, out_planes)
    x = jax.random.normal(k_x, (2, in_planes, 16, 16), jnp.float32)  # NCHW

    out = jax.block_until_ready(residual_block_forward(x, params, stride=stride))
    ref = jax.block_until_ready(reference_forward(x, params, stride=stride))

    assert out.shape == (2, out_planes, 8, 8), out.shape
    # Kernel runs the convs as bf16-input / f32-accumulate MXU matmuls (per
    # perf guidance); reference is f32 HIGHEST, hence the relaxed tolerance.
    err = float(jnp.max(jnp.abs(out - ref)))
    assert jnp.allclose(out, ref, rtol=5e-2, atol=5e-2), err
    print("KERNEL_OK")
</pallas_src>

<mosaic_0001>
module attributes {stable_mosaic.version = 11 : i64} {
  func.func @kernel(%arg0: i32, %arg1: memref<8x64xf32, #tpu.memory_space<vmem>>, %arg2: memref<8x64xf32, #tpu.memory_space<vmem>>, %arg3: memref<3x64x128xbf16, #tpu.memory_space<vmem>>, %arg4: memref<3x64x64xbf16, #tpu.memory_space<vmem>>, %arg5: memref<2x64xf32, #tpu.memory_space<vmem>>, %arg6: memref<2x128xf32, #tpu.memory_space<vmem>>, %arg7: memref<2x64xf32, #tpu.memory_space<vmem>>, %arg8: memref<8x64xf32, #tpu.memory_space<vmem>>) attributes {dimension_semantics = [#tpu.dimension_semantics<parallel>], iteration_bounds = array<i64: 2>, scalar_prefetch = 0 : i64, scratch_operands = 0 : i64, tpu.core_type = #tpu.core_type<tc>, window_params = [{transform_indices = @transform_0, window_bounds = array<i64: 8, 64>}, {transform_indices = @transform_1, window_bounds = array<i64: 8, 64>}, {pipeline_mode = #tpu.pipeline_mode<synchronous>, transform_indices = @transform_2, window_bounds = array<i64: 3, 64, 128>}, {pipeline_mode = #tpu.pipeline_mode<synchronous>, transform_indices = @transform_3, window_bounds = array<i64: 3, 64, 64>}, {pipeline_mode = #tpu.pipeline_mode<synchronous>, transform_indices = @transform_4, window_bounds = array<i64: 2, 64>}, {pipeline_mode = #tpu.pipeline_mode<synchronous>, transform_indices = @transform_5, window_bounds = array<i64: 2, 128>}, {pipeline_mode = #tpu.pipeline_mode<synchronous>, transform_indices = @transform_6, window_bounds = array<i64: 2, 64>}, {transform_indices = @transform_7, window_bounds = array<i64: 8, 64>}]} {
    %c0 = arith.constant 0 : index
    %c0_0 = arith.constant 0 : index
    %0 = vector.load %arg5[%c0, %c0_0] : memref<2x64xf32, #tpu.memory_space<vmem>>, vector<1x64xf32>
    %c1 = arith.constant 1 : index
    %c0_1 = arith.constant 0 : index
    %1 = vector.load %arg5[%c1, %c0_1] : memref<2x64xf32, #tpu.memory_space<vmem>>, vector<1x64xf32>
    %c0_2 = arith.constant 0 : index
    %c0_3 = arith.constant 0 : index
    %2 = vector.load %arg6[%c0_2, %c0_3] : memref<2x128xf32, #tpu.memory_space<vmem>>, vector<1x128xf32>
    %c1_4 = arith.constant 1 : index
    %c0_5 = arith.constant 0 : index
    %3 = vector.load %arg6[%c1_4, %c0_5] : memref<2x128xf32, #tpu.memory_space<vmem>>, vector<1x128xf32>
    %c0_6 = arith.constant 0 : index
    %c0_7 = arith.constant 0 : index
    %4 = vector.load %arg7[%c0_6, %c0_7] : memref<2x64xf32, #tpu.memory_space<vmem>>, vector<1x64xf32>
    %c1_8 = arith.constant 1 : index
    %c0_9 = arith.constant 0 : index
    %5 = vector.load %arg7[%c1_8, %c0_9] : memref<2x64xf32, #tpu.memory_space<vmem>>, vector<1x64xf32>
    %6 = tpu.iota {dimensions = array<i32: 0>} : vector<8x1xi32>
    %c8_i32 = arith.constant 8 : i32
    %c0_i32 = arith.constant 0 : i32
    %7 = arith.cmpi eq, %c8_i32, %c0_i32 : i32
    %c1_i32 = arith.constant 1 : i32
    %8 = arith.select %7, %c1_i32, %c8_i32 : i32
    %9 = vector.broadcast %8 : i32 to vector<8x1xi32>
    %10 = arith.remsi %6, %9 : vector<8x1xi32>
    %c0_i32_10 = arith.constant 0 : i32
    %11 = vector.broadcast %c0_i32_10 : i32 to vector<8x1xi32>
    %12 = arith.cmpi ne, %10, %11 : vector<8x1xi32>
    %c0_i32_11 = arith.constant 0 : i32
    %13 = vector.broadcast %c0_i32_11 : i32 to vector<8x1xi32>
    %14 = arith.cmpi slt, %10, %13 : vector<8x1xi32>
    %c0_i32_12 = arith.constant 0 : i32
    %15 = arith.cmpi slt, %8, %c0_i32_12 : i32
    %16 = vector.broadcast %15 : i1 to vector<8x1xi1>
    %17 = vector.broadcast %16 : vector<8x1xi1> to vector<8x1xi1>
    %18 = arith.xori %14, %17 : vector<8x1xi1>
    %19 = arith.andi %18, %12 : vector<8x1xi1>
    %20 = vector.broadcast %8 : i32 to vector<8x1xi32>
    %21 = arith.addi %10, %20 : vector<8x1xi32>
    %22 = arith.select %19, %21, %10 : vector<8x1xi1>, vector<8x1xi32>
    %c0_i32_13 = arith.constant 0 : i32
    %23 = vector.broadcast %c0_i32_13 : i32 to vector<8x1xi32>
    %24 = arith.cmpi ne, %22, %23 : vector<8x1xi32>
    %c8_i32_14 = arith.constant 8 : i32
    %c0_i32_15 = arith.constant 0 : i32
    %25 = arith.cmpi eq, %c8_i32_14, %c0_i32_15 : i32
    %c1_i32_16 = arith.constant 1 : i32
    %26 = arith.select %25, %c1_i32_16, %c8_i32_14 : i32
    %27 = vector.broadcast %26 : i32 to vector<8x1xi32>
    %28 = arith.remsi %6, %27 : vector<8x1xi32>
    %c0_i32_17 = arith.constant 0 : i32
    %29 = vector.broadcast %c0_i32_17 : i32 to vector<8x1xi32>
    %30 = arith.cmpi ne, %28, %29 : vector<8x1xi32>
    %c0_i32_18 = arith.constant 0 : i32
    %31 = vector.broadcast %c0_i32_18 : i32 to vector<8x1xi32>
    %32 = arith.cmpi slt, %28, %31 : vector<8x1xi32>
    %c0_i32_19 = arith.constant 0 : i32
    %33 = arith.cmpi slt, %26, %c0_i32_19 : i32
    %34 = vector.broadcast %33 : i1 to vector<8x1xi1>
    %35 = vector.broadcast %34 : vector<8x1xi1> to vector<8x1xi1>
    %36 = arith.xori %32, %35 : vector<8x1xi1>
    %37 = arith.andi %36, %30 : vector<8x1xi1>
    %38 = vector.broadcast %26 : i32 to vector<8x1xi32>
    %39 = arith.addi %28, %38 : vector<8x1xi32>
    %40 = arith.select %37, %39, %28 : vector<8x1xi1>, vector<8x1xi32>
    %c7_i32 = arith.constant 7 : i32
    %41 = vector.broadcast %c7_i32 : i32 to vector<8x1xi32>
    %42 = arith.cmpi ne, %40, %41 : vector<8x1xi32>
    %c0_20 = arith.constant 0 : index
    %c0_21 = arith.constant 0 : index
    %43 = vector.load %arg1[%c0_20, %c0_21] : memref<8x64xf32, #tpu.memory_space<vmem>>, vector<8x64xf32>
    %44 = vector.broadcast %0 : vector<1x64xf32> to vector<8x64xf32>
    %45 = arith.mulf %43, %44 : vector<8x64xf32>
    %46 = vector.broadcast %1 : vector<1x64xf32> to vector<8x64xf32>
    %47 = arith.addf %45, %46 : vector<8x64xf32>
    %cst = arith.constant 0.000000e+00 : f32
    %48 = vector.broadcast %cst : f32 to vector<8x64xf32>
    %49 = arith.maximumf %47, %48 : vector<8x64xf32>
    %c0_22 = arith.constant 0 : index
    %c0_23 = arith.constant 0 : index
    %50 = vector.load %arg2[%c0_22, %c0_23] : memref<8x64xf32, #tpu.memory_space<vmem>>, vector<8x64xf32>
    %51 = vector.broadcast %0 : vector<1x64xf32> to vector<8x64xf32>
    %52 = arith.mulf %50, %51 : vector<8x64xf32>
    %53 = vector.broadcast %1 : vector<1x64xf32> to vector<8x64xf32>
    %54 = arith.addf %52, %53 : vector<8x64xf32>
    %cst_24 = arith.constant 0.000000e+00 : f32
    %55 = vector.broadcast %cst_24 : f32 to vector<8x64xf32>
    %56 = arith.maximumf %54, %55 : vector<8x64xf32>
    %c1_i32_25 = arith.constant 1 : i32
    %57 = tpu.dynamic_rotate %56 by %c1_i32_25 dim 0 : vector<8x64xf32>, i32 -> vector<8x64xf32>
    %cst_26 = arith.constant 0.000000e+00 : f32
    %58 = vector.shape_cast %24 : vector<8x1xi1> to vector<8x1xi1>
    %59 = vector.broadcast %58 : vector<8x1xi1> to vector<8x64xi1>
    %60 = vector.broadcast %cst_26 : f32 to vector<8x64xf32>
    %61 = arith.select %59, %57, %60 : vector<8x64xi1>, vector<8x64xf32>
    %62 = arith.truncf %61 : vector<8x64xf32> to vector<8x64xbf16>
    %63 = arith.truncf %49 : vector<8x64xf32> to vector<8x64xbf16>
    %64 = arith.truncf %56 : vector<8x64xf32> to vector<8x64xbf16>
    %c0_27 = arith.constant 0 : index
    %c0_28 = arith.constant 0 : index
    %c0_29 = arith.constant 0 : index
    %65 = vector.load %arg3[%c0_27, %c0_28, %c0_29] : memref<3x64x128xbf16, #tpu.memory_space<vmem>>, vector<1x64x128xbf16>
    %66 = vector.shape_cast %65 : vector<1x64x128xbf16> to vector<64x128xbf16>
    %cst_30 = arith.constant dense<0.000000e+00> : vector<8x128xf32>
    %67 = tpu.matmul %62, %66, %cst_30 {dimension_numbers = #tpu.dot_dimension_numbers<[1], [0], [0], [1], [0, 0, 1, 1], [], []>} : vector<8x64xbf16>, vector<64x128xbf16>, vector<8x128xf32> -> vector<8x128xf32>
    %c1_31 = arith.constant 1 : index
    %c0_32 = arith.constant 0 : index
    %c0_33 = arith.constant 0 : index
    %68 = vector.load %arg3[%c1_31, %c0_32, %c0_33] : memref<3x64x128xbf16, #tpu.memory_space<vmem>>, vector<1x64x128xbf16>
    %69 = vector.shape_cast %68 : vector<1x64x128xbf16> to vector<64x128xbf16>
    %cst_34 = arith.constant dense<0.000000e+00> : vector<8x128xf32>
    %70 = tpu.matmul %63, %69, %cst_34 {dimension_numbers = #tpu.dot_dimension_numbers<[1], [0], [0], [1], [0, 0, 1, 1], [], []>} : vector<8x64xbf16>, vector<64x128xbf16>, vector<8x128xf32> -> vector<8x128xf32>
    %71 = arith.addf %67, %70 : vector<8x128xf32>
    %c2 = arith.constant 2 : index
    %c0_35 = arith.constant 0 : index
    %c0_36 = arith.constant 0 : index
    %72 = vector.load %arg3[%c2, %c0_35, %c0_36] : memref<3x64x128xbf16, #tpu.memory_space<vmem>>, vector<1x64x128xbf16>
    %73 = vector.shape_cast %72 : vector<1x64x128xbf16> to vector<64x128xbf16>
    %cst_37 = arith.constant dense<0.000000e+00> : vector<8x128xf32>
    %74 = tpu.matmul %64, %73, %cst_37 {dimension_numbers = #tpu.dot_dimension_numbers<[1], [0], [0], [1], [0, 0, 1, 1], [], []>} : vector<8x64xbf16>, vector<64x128xbf16>, vector<8x128xf32> -> vector<8x128xf32>
    %75 = arith.addf %71, %74 : vector<8x128xf32>
    %76 = vector.broadcast %2 : vector<1x128xf32> to vector<8x128xf32>
    %77 = arith.mulf %75, %76 : vector<8x128xf32>
    %78 = vector.broadcast %3 : vector<1x128xf32> to vector<8x128xf32>
    %79 = arith.addf %77, %78 : vector<8x128xf32>
    %80 = vector.extract_strided_slice %79 {offsets = [0, 0], sizes = [8, 64], strides = [1, 1]} : vector<8x128xf32> to vector<8x64xf32>
    %cst_38 = arith.constant 0.000000e+00 : f32
    %81 = vector.broadcast %cst_38 : f32 to vector<8x64xf32>
    %82 = arith.maximumf %80, %81 : vector<8x64xf32>
    %83 = vector.extract_strided_slice %79 {offsets = [0, 64], sizes = [8, 64], strides = [1, 1]} : vector<8x128xf32> to vector<8x64xf32>
    %84 = arith.truncf %82 : vector<8x64xf32> to vector<8x64xbf16>
    %c1_i32_39 = arith.constant 1 : i32
    %85 = tpu.dynamic_rotate %82 by %c1_i32_39 dim 0 : vector<8x64xf32>, i32 -> vector<8x64xf32>
    %cst_40 = arith.constant 0.000000e+00 : f32
    %86 = vector.shape_cast %24 : vector<8x1xi1> to vector<8x1xi1>
    %87 = vector.broadcast %86 : vector<8x1xi1> to vector<8x64xi1>
    %88 = vector.broadcast %cst_40 : f32 to vector<8x64xf32>
    %89 = arith.select %87, %85, %88 : vector<8x64xi1>, vector<8x64xf32>
    %90 = arith.truncf %89 : vector<8x64xf32> to vector<8x64xbf16>
    %c7_i32_41 = arith.constant 7 : i32
    %91 = tpu.dynamic_rotate %82 by %c7_i32_41 dim 0 : vector<8x64xf32>, i32 -> vector<8x64xf32>
    %cst_42 = arith.constant 0.000000e+00 : f32
    %92 = vector.shape_cast %42 : vector<8x1xi1> to vector<8x1xi1>
    %93 = vector.broadcast %92 : vector<8x1xi1> to vector<8x64xi1>
    %94 = vector.broadcast %cst_42 : f32 to vector<8x64xf32>
    %95 = arith.select %93, %91, %94 : vector<8x64xi1>, vector<8x64xf32>
    %96 = arith.truncf %95 : vector<8x64xf32> to vector<8x64xbf16>
    %c0_43 = arith.constant 0 : index
    %c0_44 = arith.constant 0 : index
    %c0_45 = arith.constant 0 : index
    %97 = vector.load %arg4[%c0_43, %c0_44, %c0_45] : memref<3x64x64xbf16, #tpu.memory_space<vmem>>, vector<1x64x64xbf16>
    %98 = vector.shape_cast %97 : vector<1x64x64xbf16> to vector<64x64xbf16>
    %cst_46 = arith.constant dense<0.000000e+00> : vector<8x64xf32>
    %99 = tpu.matmul %90, %98, %cst_46 {dimension_numbers = #tpu.dot_dimension_numbers<[1], [0], [0], [1], [0, 0, 1, 1], [], []>} : vector<8x64xbf16>, vector<64x64xbf16>, vector<8x64xf32> -> vector<8x64xf32>
    %c1_47 = arith.constant 1 : index
    %c0_48 = arith.constant 0 : index
    %c0_49 = arith.constant 0 : index
    %100 = vector.load %arg4[%c1_47, %c0_48, %c0_49] : memref<3x64x64xbf16, #tpu.memory_space<vmem>>, vector<1x64x64xbf16>
    %101 = vector.shape_cast %100 : vector<1x64x64xbf16> to vector<64x64xbf16>
    %cst_50 = arith.constant dense<0.000000e+00> : vector<8x64xf32>
    %102 = tpu.matmul %84, %101, %cst_50 {dimension_numbers = #tpu.dot_dimension_numbers<[1], [0], [0], [1], [0, 0, 1, 1], [], []>} : vector<8x64xbf16>, vector<64x64xbf16>, vector<8x64xf32> -> vector<8x64xf32>
    %103 = arith.addf %99, %102 : vector<8x64xf32>
    %c2_51 = arith.constant 2 : index
    %c0_52 = arith.constant 0 : index
    %c0_53 = arith.constant 0 : index
    %104 = vector.load %arg4[%c2_51, %c0_52, %c0_53] : memref<3x64x64xbf16, #tpu.memory_space<vmem>>, vector<1x64x64xbf16>
    %105 = vector.shape_cast %104 : vector<1x64x64xbf16> to vector<64x64xbf16>
    %cst_54 = arith.constant dense<0.000000e+00> : vector<8x64xf32>
    %106 = tpu.matmul %96, %105, %cst_54 {dimension_numbers = #tpu.dot_dimension_numbers<[1], [0], [0], [1], [0, 0, 1, 1], [], []>} : vector<8x64xbf16>, vector<64x64xbf16>, vector<8x64xf32> -> vector<8x64xf32>
    %107 = arith.addf %103, %106 : vector<8x64xf32>
    %108 = vector.broadcast %4 : vector<1x64xf32> to vector<8x64xf32>
    %109 = arith.mulf %107, %108 : vector<8x64xf32>
    %110 = vector.broadcast %5 : vector<1x64xf32> to vector<8x64xf32>
    %111 = arith.addf %109, %110 : vector<8x64xf32>
    %cst_55 = arith.constant 0.000000e+00 : f32
    %112 = vector.broadcast %cst_55 : f32 to vector<8x64xf32>
    %113 = arith.maximumf %111, %112 : vector<8x64xf32>
    %114 = arith.addf %113, %83 : vector<8x64xf32>
    %c0_56 = arith.constant 0 : index
    %c0_57 = arith.constant 0 : index
    %115 = vector.load %arg8[%c0_56, %c0_57] : memref<8x64xf32, #tpu.memory_space<vmem>>, vector<8x64xf32>
    tpu.vector_store %arg8[%c0_56, %c0_57], %114 {strides = array<i32>} : memref<8x64xf32, #tpu.memory_space<vmem>>, vector<8x64xf32>,
    return
  }
  func.func @transform_0(%arg0: i32) -> (i32, i32) {
    %c0_i32 = arith.constant 0 : i32
    %c0_i32_0 = arith.constant 0 : i32
    return %arg0, %c0_i32 : i32, i32
  }
  func.func @transform_1(%arg0: i32) -> (i32, i32) {
    %c0_i32 = arith.constant 0 : i32
    %c0_i32_0 = arith.constant 0 : i32
    return %arg0, %c0_i32 : i32, i32
  }
  func.func @transform_2(%arg0: i32) -> (i32, i32, i32) {
    %c0_i32 = arith.constant 0 : i32
    %c0_i32_0 = arith.constant 0 : i32
    %c0_i32_1 = arith.constant 0 : i32
    %c0_i32_2 = arith.constant 0 : i32
    return %c0_i32, %c0_i32_0, %c0_i32_1 : i32, i32, i32
  }
  func.func @transform_3(%arg0: i32) -> (i32, i32, i32) {
    %c0_i32 = arith.constant 0 : i32
    %c0_i32_0 = arith.constant 0 : i32
    %c0_i32_1 = arith.constant 0 : i32
    %c0_i32_2 = arith.constant 0 : i32
    return %c0_i32, %c0_i32_0, %c0_i32_1 : i32, i32, i32
  }
  func.func @transform_4(%arg0: i32) -> (i32, i32) {
    %c0_i32 = arith.constant 0 : i32
    %c0_i32_0 = arith.constant 0 : i32
    %c0_i32_1 = arith.constant 0 : i32
    return %c0_i32, %c0_i32_0 : i32, i32
  }
  func.func @transform_5(%arg0: i32) -> (i32, i32) {
    %c0_i32 = arith.constant 0 : i32
    %c0_i32_0 = arith.constant 0 : i32
    %c0_i32_1 = arith.constant 0 : i32
    return %c0_i32, %c0_i32_0 : i32, i32
  }
  func.func @transform_6(%arg0: i32) -> (i32, i32) {
    %c0_i32 = arith.constant 0 : i32
    %c0_i32_0 = arith.constant 0 : i32
    %c0_i32_1 = arith.constant 0 : i32
    return %c0_i32, %c0_i32_0 : i32, i32
  }
  func.func @transform_7(%arg0: i32) -> (i32, i32) {
    %c0_i32 = arith.constant 0 : i32
    %c0_i32_0 = arith.constant 0 : i32
    return %arg0, %c0_i32 : i32, i32
  }
}

</mosaic_0001>

<bundles_post_ra>
// kernel: tile.53
= control target key start
LH: loop header
LB: loop body
LE: loop exit
PB: predicated region body
PF: predicated region fallthrough
CT: control target
= control target key end

     0   :  { %s22_s0 = inlined_call_operand.vmem [shape: f32[8], index: 0, kind: input, shape index: {}]   ;;  %s23_s1 = inlined_call_operand.vmem [shape: f32[8,8], index: 1, kind: output, shape index: {}]  }
   0x1   :  { %v4_v0 = vld [vmem:[%s22_s0] ss:$0 sm:$0xff] }
   0x2   :  { %5 = vst [vmem:[%s23_s1] sm:$0xff] %v4_v0 }

// kernel: tile.54
= control target key start
LH: loop header
LB: loop body
LE: loop exit
PB: predicated region body
PF: predicated region fallthrough
CT: control target
= control target key end

     0   :  { %s69_s10 = smov 56   ;;  %s70_s11 = smov 40   ;;  %vm3_vm0 = vcmask 64512   ;;  %vm9_vm1 = vcmask 523712   ;;  %vm15_vm2 = vcmask 458112   ;;  %vm21_vm3 = vcmask 392512   ;;  %s113_s0 = inlined_call_operand.vmem [shape: f32[8,8], index: 0, kind: input, shape index: {}]   ;;  %s114_s1 = inlined_call_operand.vmem [shape: f32[64], index: 1, kind: output, shape index: {}]  }
   0x1   :  { %v55_v0 = vld [vmem:[%s113_s0 + $0x7] sm:$0x1]   ;;  %v57_v1 = vld [vmem:[%s113_s0 + $0x5] sm:$0x1]   ;;  %v56_v2 = vld [vmem:[%s113_s0 + $0x6] sm:$0x1]  }
   0x2   :  { %7 = vrot.lane.b32.xlu0 %v55_v0, %s69_s10  ;;  %19 = vrot.lane.b32.xlu1 %v57_v1, %s70_s11  ;;  %v58_v3 = vld [vmem:[%s113_s0 + $0x4] sm:$0x1]   ;;  %v2_v4 = vld [vmem:[%s113_s0] sm:$0x1]   ;;  %s71_s18 = smov 48   ;;  %s72_s19 = smov 32  }
   0x3   :  { %4 = vst.msk [vmem:[#allocation0] sm:$0x1] %vm3_vm0, %v2_v4   ;;  %v59_v5 = vld [vmem:[%s113_s0 + $0x3] sm:$0x1]   ;;  %v60_v6 = vld [vmem:[%s113_s0 + $0x2] sm:$0x1]  }
   0x4   :  { %s73_s24 = smov 24   ;;  %s74_s25 = smov 16   ;;  %v61_v7 = vld [vmem:[%s113_s0 + $0x1] sm:$0x1]   ;;  %vm27_vm4 = vcmask 326912   ;;  %vm33_vm5 = vcmask 261312  }
   0x5   :  { %s75_s0 = smov 8   ;;  %vm39_vm6 = vcmask 195712   ;;  %vm45_vm7 = vcmask 130112  }
   0x6   :  { %13 = vrot.lane.b32.xlu0 %v56_v2, %s71_s18  ;;  %25 = vrot.lane.b32.xlu1 %v58_v3, %s72_s19 }
   0xa   :  { %31 = vrot.lane.b32.xlu0 %v59_v5, %s73_s24  ;;  %37 = vrot.lane.b32.xlu1 %v60_v6, %s74_s25 }
   0xe   :  { %43 = vrot.lane.b32.xlu0 %v61_v7, %s75_s0 }
  0x74   :  { %v8_v8 = vpop.permute.xlu0 %7   ;;  %v20_v9 = vpop.permute.xlu1 %19  }
  0x75   :  { %10 = vst.msk [vmem:[#allocation0] sm:$0x1] %vm9_vm1, %v8_v8  }
  0x78   :  { %v14_v10 = vpop.permute.xlu0 %13   ;;  %v26_v11 = vpop.permute.xlu1 %25  }
  0x79   :  { %16 = vst.msk [vmem:[#allocation0] sm:$0x1] %vm15_vm2, %v14_v10  }
  0x7a   :  { %22 = vst.msk [vmem:[#allocation0] sm:$0x1] %vm21_vm3, %v20_v9  }
  0x7b   :  { %28 = vst.msk [vmem:[#allocation0] sm:$0x1] %vm27_vm4, %v26_v11  }
  0x7c   :  { %v32_v12 = vpop.permute.xlu0 %31   ;;  %v38_v13 = vpop.permute.xlu1 %37  }
  0x7d   :  { %34 = vst.msk [vmem:[#allocation0] sm:$0x1] %vm33_vm5, %v32_v12  }
  0x7e   :  { %40 = vst.msk [vmem:[#allocation0] sm:$0x1] %vm39_vm6, %v38_v13  }
  0x80   :  { %v44_v14 = vpop.permute.xlu0 %43  }
  0x81   :  { %46 = vst.msk [vmem:[#allocation0] sm:$0x1] %vm45_vm7, %v44_v14  }
  0x88   :  { %v51_v15 = vld [vmem:[#allocation0] sm:$0x1] }
  0x89   :  { %54 = vst [vmem:[%s114_s1] sm:$0x1] %v51_v15 }

// kernel: tile.43
= control target key start
LH: loop header
LB: loop body
LE: loop exit
PB: predicated region body
PF: predicated region fallthrough
CT: control target
= control target key end

     0   :  { %s28_s0 = inlined_call_operand.vmem [shape: f32[4], index: 0, kind: input, shape index: {}]   ;;  %s29_s1 = inlined_call_operand.vmem [shape: f32[16,4], index: 1, kind: output, shape index: {}]  }
   0x1   :  { %v4_v0 = vld [vmem:[%s28_s0] ss:$0 sm:$0xff] }
   0x2   :  { %5 = vst [vmem:[%s29_s1] sm:$0xff] %v4_v0  ;;  %8 = vst [vmem:[%s29_s1 + $0x8] sm:$0xff] %v4_v0 }

// kernel: tile.48
= control target key start
LH: loop header
LB: loop body
LE: loop exit
PB: predicated region body
PF: predicated region fallthrough
CT: control target
= control target key end

     0   :  { %s133_s10 = smov 60   ;;  %s134_s11 = smov 52   ;;  %vm3_vm0 = vcmask 31744   ;;  %vm9_vm1 = vcmask 523744   ;;  %vm15_vm2 = vcmask 490944   ;;  %vm21_vm3 = vcmask 458144   ;;  %s209_s0 = inlined_call_operand.vmem [shape: f32[16,4], index: 0, kind: input, shape index: {}]   ;;  %s210_s1 = inlined_call_operand.vmem [shape: f32[1,64], index: 1, kind: output, shape index: {}]  }
   0x1   :  { %v103_v0 = vld [vmem:[%s209_s0 + $0xf] sm:$0x1]   ;;  %v105_v1 = vld [vmem:[%s209_s0 + $0xd] sm:$0x1]   ;;  %v104_v2 = vld [vmem:[%s209_s0 + $0xe] sm:$0x1]  }
   0x2   :  { %7 = vrot.lane.b32.xlu0 %v103_v0, %s133_s10  ;;  %19 = vrot.lane.b32.xlu1 %v105_v1, %s134_s11  ;;  %v106_v3 = vld [vmem:[%s209_s0 + $0xc] sm:$0x1]   ;;  %s135_s16 = smov 56   ;;  %s136_s17 = smov 48   ;;  %v107_v4 = vld [vmem:[%s209_s0 + $0xb] sm:$0x1]  }
   0x3   :  { %v108_v5 = vld [vmem:[%s209_s0 + $0xa] sm:$0x1]   ;;  %v2_v6 = vld [vmem:[%s209_s0] sm:$0x1]   ;;  %s137_s24 = smov 44   ;;  %s138_s25 = smov 40  }
   0x4   :  { %4 = vst.msk [vmem:[#allocation0] sm:$0x1] %vm3_vm0, %v2_v6   ;;  %v109_v7 = vld [vmem:[%s209_s0 + $0x9] sm:$0x1]   ;;  %v110_v8 = vld [vmem:[%s209_s0 + $0x8] sm:$0x1]  }
   0x5   :  { %s139_s30 = smov 36   ;;  %s140_s2 = smov 32   ;;  %v111_v9 = vld [vmem:[%s209_s0 + $0x7] sm:$0x1]   ;;  %v112_v10 = vld [vmem:[%s209_s0 + $0x6] sm:$0x1]  }
   0x6   :  { %13 = vrot.lane.b32.xlu0 %v104_v2, %s135_s16  ;;  %25 = vrot.lane.b32.xlu1 %v106_v3, %s136_s17  ;;  %s141_s7 = smov 28   ;;  %s142_s8 = smov 24   ;;  %v113_v11 = vld [vmem:[%s209_s0 + $0x5] sm:$0x1]   ;;  %v114_v12 = vld [vmem:[%s209_s0 + $0x4] sm:$0x1]  }
   0x7   :  { %s143_s13 = smov 20   ;;  %s144_s14 = smov 16   ;;  %v115_v13 = vld [vmem:[%s209_s0 + $0x3] sm:$0x1]   ;;  %v116_v14 = vld [vmem:[%s209_s0 + $0x2] sm:$0x1]  }
   0x8   :  { %s145_s19 = smov 12   ;;  %s146_s20 = smov 8   ;;  %v117_v15 = vld [vmem:[%s209_s0 + $0x1] sm:$0x1]   ;;  %vm27_vm4 = vcmask 425344   ;;  %vm33_vm5 = vcmask 392544  }
   0x9   :  { %s147_s0 = smov 4   ;;  %vm39_vm6 = vcmask 359744   ;;  %vm45_vm7 = vcmask 326944   ;;  %vm51_vm8 = vcmask 294144   ;;  %vm57_vm9 = vcmask 261344  }
   0xa   :  { %31 = vrot.lane.b32.xlu0 %v107_v4, %s137_s24  ;;  %37 = vrot.lane.b32.xlu1 %v108_v5, %s138_s25  ;;  %vm63_vm10 = vcmask 228544   ;;  %vm69_vm11 = vcmask 195744   ;;  %vm75_vm12 = vcmask 162944   ;;  %vm81_vm13 = vcmask 130144  }
   0xb   :  { %vm87_vm14 = vcmask 97344   ;;  %vm93_vm15 = vcmask 64544  }
   0xe   :  { %43 = vrot.lane.b32.xlu0 %v109_v7, %s139_s30  ;;  %49 = vrot.lane.b32.xlu1 %v110_v8, %s140_s2 }
  0x12   :  { %55 = vrot.lane.b32.xlu0 %v111_v9, %s141_s7  ;;  %61 = vrot.lane.b32.xlu1 %v112_v10, %s142_s8 }
  0x16   :  { %67 = vrot.lane.b32.xlu0 %v113_v11, %s143_s13  ;;  %73 = vrot.lane.b32.xlu1 %v114_v12, %s144_s14 }
  0x1a   :  { %79 = vrot.lane.b32.xlu0 %v115_v13, %s145_s19  ;;  %85 = vrot.lane.b32.xlu1 %v116_v14, %s146_s20 }
  0x1e   :  { %91 = vrot.lane.b32.xlu0 %v117_v15, %s147_s0 }
  0x74   :  { %v8_v16 = vpop.permute.xlu0 %7   ;;  %v20_v17 = vpop.permute.xlu1 %19  }
  0x75   :  { %10 = vst.msk [vmem:[#allocation0] sm:$0x1] %vm9_vm1, %v8_v16  }
  0x78   :  { %v14_v18 = vpop.permute.xlu0 %13   ;;  %v26_v19 = vpop.permute.xlu1 %25  }
  0x79   :  { %16 = vst.msk [vmem:[#allocation0] sm:$0x1] %vm15_vm2, %v14_v18  }
  0x7a   :  { %22 = vst.msk [vmem:[#allocation0] sm:$0x1] %vm21_vm3, %v20_v17  }
  0x7b   :  { %28 = vst.msk [vmem:[#allocation0] sm:$0x1] %vm27_vm4, %v26_v19  }
  0x7c   :  { %v32_v20 = vpop.permute.xlu0 %31   ;;  %v38_v21 = vpop.permute.xlu1 %37  }
  0x7d   :  { %34 = vst.msk [vmem:[#allocation0] sm:$0x1] %vm33_vm5, %v32_v20  }
  0x7e   :  { %40 = vst.msk [vmem:[#allocation0] sm:$0x1] %vm39_vm6, %v38_v21  }
  0x80   :  { %v44_v22 = vpop.permute.xlu0 %43   ;;  %v50_v23 = vpop.permute.xlu1 %49  }
  0x81   :  { %46 = vst.msk [vmem:[#allocation0] sm:$0x1] %vm45_vm7, %v44_v22  }
  0x82   :  { %52 = vst.msk [vmem:[#allocation0] sm:$0x1] %vm51_vm8, %v50_v23  }
  0x84   :  { %v56_v24 = vpop.permute.xlu0 %55   ;;  %v62_v25 = vpop.permute.xlu1 %61  }
  0x85   :  { %58 = vst.msk [vmem:[#allocation0] sm:$0x1] %vm57_vm9, %v56_v24  }
  0x86   :  { %64 = vst.msk [vmem:[#allocation0] sm:$0x1] %vm63_vm10, %v62_v25  }
  0x88   :  { %v68_v26 = vpop.permute.xlu0 %67   ;;  %v74_v27 = vpop.permute.xlu1 %73  }
  0x89   :  { %70 = vst.msk [vmem:[#allocation0] sm:$0x1] %vm69_vm11, %v68_v26  }
  0x8a   :  { %76 = vst.msk [vmem:[#allocation0] sm:$0x1] %vm75_vm12, %v74_v27  }
  0x8c   :  { %v80_v28 = vpop.permute.xlu0 %79   ;;  %v86_v29 = vpop.permute.xlu1 %85  }
  0x8d   :  { %82 = vst.msk [vmem:[#allocation0] sm:$0x1] %vm81_vm13, %v80_v28  }
  0x8e   :  { %88 = vst.msk [vmem:[#allocation0] sm:$0x1] %vm87_vm14, %v86_v29  }
  0x90   :  { %v92_v30 = vpop.permute.xlu0 %91  }
  0x91   :  { %94 = vst.msk [vmem:[#allocation0] sm:$0x1] %vm93_vm15, %v92_v30  }
  0x98   :  { %v99_v31 = vld [vmem:[#allocation0] sm:$0x1] }
  0x99   :  { %102 = vst [vmem:[%s210_s1] sm:$0x1] %v99_v31 }

// kernel: tile.78
= control target key start
LH: loop header
LB: loop body
LE: loop exit
PB: predicated region body
PF: predicated region fallthrough
CT: control target
= control target key end

     0   :  { %s69_s10 = smov 56   ;;  %s70_s11 = smov 40   ;;  %vm3_vm0 = vcmask 64512   ;;  %vm9_vm1 = vcmask 523712   ;;  %vm15_vm2 = vcmask 458112   ;;  %vm21_vm3 = vcmask 392512   ;;  %s113_s0 = inlined_call_operand.vmem [shape: f32[8,8], index: 0, kind: input, shape index: {}]   ;;  %s114_s1 = inlined_call_operand.vmem [shape: f32[1,64], index: 1, kind: output, shape index: {}]  }
   0x1   :  { %v55_v0 = vld [vmem:[%s113_s0 + $0x7] sm:$0x1]   ;;  %v57_v1 = vld [vmem:[%s113_s0 + $0x5] sm:$0x1]   ;;  %v56_v2 = vld [vmem:[%s113_s0 + $0x6] sm:$0x1]  }
   0x2   :  { %7 = vrot.lane.b32.xlu0 %v55_v0, %s69_s10  ;;  %19 = vrot.lane.b32.xlu1 %v57_v1, %s70_s11  ;;  %v58_v3 = vld [vmem:[%s113_s0 + $0x4] sm:$0x1]   ;;  %v2_v4 = vld [vmem:[%s113_s0] sm:$0x1]   ;;  %s71_s18 = smov 48   ;;  %s72_s19 = smov 32  }
   0x3   :  { %4 = vst.msk [vmem:[#allocation0] sm:$0x1] %vm3_vm0, %v2_v4   ;;  %v59_v5 = vld [vmem:[%s113_s0 + $0x3] sm:$0x1]   ;;  %v60_v6 = vld [vmem:[%s113_s0 + $0x2] sm:$0x1]  }
   0x4   :  { %s73_s24 = smov 24   ;;  %s74_s25 = smov 16   ;;  %v61_v7 = vld [vmem:[%s113_s0 + $0x1] sm:$0x1]   ;;  %vm27_vm4 = vcmask 326912   ;;  %vm33_vm5 = vcmask 261312  }
   0x5   :  { %s75_s0 = smov 8   ;;  %vm39_vm6 = vcmask 195712   ;;  %vm45_vm7 = vcmask 130112  }
   0x6   :  { %13 = vrot.lane.b32.xlu0 %v56_v2, %s71_s18  ;;  %25 = vrot.lane.b32.xlu1 %v58_v3, %s72_s19 }
   0xa   :  { %31 = vrot.lane.b32.xlu0 %v59_v5, %s73_s24  ;;  %37 = vrot.lane.b32.xlu1 %v60_v6, %s74_s25 }
   0xe   :  { %43 = vrot.lane.b32.xlu0 %v61_v7, %s75_s0 }
  0x74   :  { %v8_v8 = vpop.permute.xlu0 %7   ;;  %v20_v9 = vpop.permute.xlu1 %19  }
  0x75   :  { %10 = vst.msk [vmem:[#allocation0] sm:$0x1] %vm9_vm1, %v8_v8  }
  0x78   :  { %v14_v10 = vpop.permute.xlu0 %13   ;;  %v26_v11 = vpop.permute.xlu1 %25  }
  0x79   :  { %16 = vst.msk [vmem:[#allocation0] sm:$0x1] %vm15_vm2, %v14_v10  }
  0x7a   :  { %22 = vst.msk [vmem:[#allocation0] sm:$0x1] %vm21_vm3, %v20_v9  }
  0x7b   :  { %28 = vst.msk [vmem:[#allocation0] sm:$0x1] %vm27_vm4, %v26_v11  }
  0x7c   :  { %v32_v12 = vpop.permute.xlu0 %31   ;;  %v38_v13 = vpop.permute.xlu1 %37  }
  0x7d   :  { %34 = vst.msk [vmem:[#allocation0] sm:$0x1] %vm33_vm5, %v32_v12  }
  0x7e   :  { %40 = vst.msk [vmem:[#allocation0] sm:$0x1] %vm39_vm6, %v38_v13  }
  0x80   :  { %v44_v14 = vpop.permute.xlu0 %43  }
  0x81   :  { %46 = vst.msk [vmem:[#allocation0] sm:$0x1] %vm45_vm7, %v44_v14  }
  0x88   :  { %v51_v15 = vld [vmem:[#allocation0] sm:$0x1] }
  0x89   :  { %54 = vst [vmem:[%s114_s1] sm:$0x1] %v51_v15 }

// kernel: residual_block_forward.1
= control target key start
LH: loop header
LB: loop body
LE: loop exit
PB: predicated region body
PF: predicated region fallthrough
CT: control target
= control target key end

     0   :  { %s1162_s24 = smov 0   ;;  %s1335_s0 = inlined_call_operand.vmem [shape: f32[16,64], index: 0, kind: input, shape index: {}]   ;;  %s1336_s1 = inlined_call_operand.vmem [shape: f32[16,64], index: 1, kind: input, shape index: {}]   ;;  %s1337_s2 = inlined_call_operand.vmem [shape: bf16[3,64,128], index: 2, kind: input, shape index: {}]   ;;  %s1338_s3 = inlined_call_operand.vmem [shape: bf16[3,64,64], index: 3, kind: input, shape index: {}]   ;;  %s1339_s4 = inlined_call_operand.vmem [shape: f32[2,64], index: 4, kind: input, shape index: {}]   ;;  %s1340_s5 = inlined_call_operand.vmem [shape: f32[2,128], index: 5, kind: input, shape index: {}]   ;;  %s1341_s6 = inlined_call_operand.vmem [shape: f32[2,64], index: 6, kind: input, shape index: {}]   ;;  %s1342_s7 = inlined_call_operand.vmem [shape: f32[16,64], index: 7, kind: output, shape index: {}]  }
   0x1 LB: > { %s896_s25 = sadd.s32 4294967295, %s1117_s24   ;;  %p900_p0 = scmp.ge.s32.totalorder %s1117_s24, 1  ;;  %s1117_s24 = sphi %s1162_s24, %s17_s24  }
   0x2   : > { %p245_p1 = scmp.lt.s32.totalorder %s1117_s24, 3 }
   0x4   : > { %p246_p2 = pnand %p900_p0, %p245_p1 }
   0x5   : > { %p279_p3 = scmp.lt.s32.totalorder (!%p246_p2), %s896_s25, 1  ;;  %s1121_s16 = smov (!%p246_p2), 64  }
   0x6   : > { %249 = sbr.rel (%p246_p2) target bundleno = 467 (0x1d3), region = 48 }
   0xb   : > { %v1087_v0 = vld [vmem:[%s1337_s2 + $0x38] sm:$0xff]   ;;  %v1119_v1 = vmov 0.0   ;;  %v298_v3 = vlaneseq  ;;  %v1089_v4 = vld [vmem:[%s1337_s2 + $0x30] sm:$0xff]   ;;  %vm1120_vm0 = vmmov 0   ;;  %s1346_s25 = smov (!%p279_p3, %s896_s25), 1  ;;  %v1091_v7 = vld [vmem:[%s1337_s2 + $0x28] sm:$0xff]  }
   0xc   : > { %1004 = vmatprep.subr.bf16.mxu0 %v1119_v1  ;;  %1016 = vmatprep.subr.bf16.mxu1 %v1119_v1  ;;  %v1088_v2 = vld [vmem:[%s1337_s2 + $0x18] sm:$0xff]   ;;  %v1090_v5 = vld [vmem:[%s1337_s2 + $0x10] sm:$0xff]   ;;  %s1195_s13 = sshll.u32 %s1346_s25, 3  ;;  %v1092_v8 = vld [vmem:[%s1337_s2 + $0x8] sm:$0xff]   ;;  %vm378_vm1 = vcmask 523264  }
   0xd   : > { %1005 = vmatpush3.bf16.msra.mxu0 %v1087_v0  ;;  %1012 = vmatprep.mubr.msk.bf16.mxu0 %vm1120_vm0, %v1119_v1  ;;  %v1190_v6 = vshrl.u32 %v298_v3, 7  ;;  %s282_s18 = scalar_lea.vmem %s1335_s0, %s1195_s13  ;;  %s286_s21 = scalar_lea.vmem %s1336_s1, %s1195_s13  ;;  %v904_v9 = vld [vmem:[%s1339_s4] ss:$0 sm:$0xff]  ;;  %v905_v10 = vld [vmem:[%s1339_s4 + $0x1] ss:$0 sm:$0xff]  ;;  %v1095_v23 = vld [vmem:[%s1337_s2 + $0x58] sm:$0xff]  }
   0xe   : > { %1017 = vmatpush3.bf16.msra.mxu1 %v1088_v2  ;;  %1006 = vmatprep.subr.bf16.mxu0 %v1119_v1  ;;  %v314_v11 = vld [vmem:[%s282_s18] sm:$0xff]  ;;  %v1096_v27 = vld [vmem:[%s1337_s2 + $0x50] sm:$0xff]   ;;  %v1097_v29 = vld [vmem:[%s1337_s2 + $0x48] sm:$0xff]   ;;  %s290_s9 = scalar_lea.vmem %s1342_s7, %s1195_s13 }
   0xf   : > { %1018 = vmatprep.subr.bf16.mxu1 %v1119_v1  ;;  %1024 = vmatprep.mubr.msk.bf16.mxu1 %vm1120_vm0, %v1119_v1  ;;  %v319_v12 = vmul.f32 %v904_v9, %v314_v11  ;;  %v326_v13 = vld [vmem:[%s286_s21] sm:$0xff]  ;;  %v304_v14 = vand.u32 7, %v1190_v6  ;;  %v1099_v32 = vld [vmem:[%s1338_s3 + $0x38] sm:$0xff]   ;;  %v1100_v33 = vld [vmem:[%s1338_s3 + $0x30] sm:$0xff]  }
  0x10   : > { %v1093_v15 = vld [vmem:[%s1337_s2 + $0x20] sm:$0xff]   ;;  %v327_v16 = vmul.f32 %v904_v9, %v326_v13  ;;  %v1101_v34 = vld [vmem:[%s1338_s3 + $0x18] sm:$0xff]   ;;  %v1102_v35 = vld [vmem:[%s1338_s3 + $0x28] sm:$0xff]  }
  0x11   : > { %1007 = vmatpush3.bf16.msra.mxu0 %v1089_v4  ;;  %v1094_v17 = vld [vmem:[%s1337_s2] sm:$0xff]   ;;  %v324_v18 = vadd.f32 %v905_v10, %v319_v12  ;;  %vm1227_vm2 = vcmp.ne.s32.totalorder %v304_v14, 0  ;;  %v1103_v36 = vld [vmem:[%s1338_s3 + $0x10] sm:$0xff]   ;;  %v1105_v38 = vld [vmem:[%s1338_s3 + $0x8] sm:$0xff]   ;;  %vm313_vm3 = vcmp.ne.s32.totalorder %v304_v14, 7 }
  0x12   : > { %1019 = vmatpush3.bf16.msra.mxu1 %v1090_v5  ;;  %1008 = vmatprep.subr.bf16.mxu0 %v1119_v1  ;;  %v328_v19 = vadd.f32 %v905_v10, %v327_v16  ;;  %v1098_v30 = vld [vmem:[%s1337_s2 + $0x40] sm:$0xff]   ;;  %v1107_v59 = vld [vmem:[%s1338_s3 + $0x58] sm:$0xff]   ;;  %v1108_v0 = vld [vmem:[%s1338_s3 + $0x50] sm:$0xff]  }
  0x13   : > { %1020 = vmatprep.subr.bf16.mxu1 %v1119_v1  ;;  %v325_v20 = vmax.f32 %v324_v18, 0.0  ;;  %v1104_v37 = vld [vmem:[%s1338_s3 + $0x20] sm:$0xff]   ;;  %v1109_v2 = vld [vmem:[%s1338_s3 + $0x48] sm:$0xff]  }
  0x14   : > { %v329_v22 = vmax.f32 %v328_v19, 0.0  ;;  %v1106_v39 = vld [vmem:[%s1338_s3] sm:$0xff]  }
  0x15   : > { %1009 = vmatpush3.bf16.msra.mxu0 %v1091_v7  ;;  %v335_v24 = vpack.c.bf16 %v325_v20, %v325_v20  ;;  %v937_v49 = vld [vmem:[%s1340_s5] ss:$0 sm:$0xff]  ;;  %v938_v53 = vld [vmem:[%s1340_s5 + $0x1] ss:$0 sm:$0xff] }
  0x16   : > { %1021 = vmatpush3.bf16.msra.mxu1 %v1092_v8  ;;  %1010 = vmatprep.subr.bf16.mxu0 %v1119_v1  ;;  %v330_v25 = vrot.slane %v329_v22, 7  ;;  %v336_v31 = vpack.c.bf16 %v329_v22, %v329_v22  ;;  %v1110_v4 = vld [vmem:[%s1338_s3 + $0x40] sm:$0xff]  }
  0x17   : > { %1022 = vmatprep.subr.bf16.mxu1 %v1119_v1  ;;  %v970_v16 = vld [vmem:[%s1341_s6] ss:$0 sm:$0xff]  ;;  %v971_v18 = vld [vmem:[%s1341_s6 + $0x1] ss:$0 sm:$0xff] }
  0x18   : > { %v333_v26 = vsel %vm1227_vm2, %v330_v25, 0.0 }
  0x19   : > { %1011 = vmatpush3.bf16.msra.mxu0 %v1093_v15  ;;  %v334_v28 = vpack.c.bf16 %v333_v26, %v333_v26 }
  0x1a   : > { %1023 = vmatpush3.bf16.msra.mxu1 %v1094_v17  ;;  %1028 = vmatprep.subr.bf16.mxu0 %v1119_v1 }
  0x1b   : > { %1040 = vmatprep.subr.bf16.mxu1 %v1119_v1 }
  0x1c   : > { %1013 = vmatmul.mubr.msk.bf16.vlgmr.msra.gmra.mxu0 %vm378_vm1, %v335_v24 }
  0x1d   : > { %1029 = vmatpush3.bf16.msra.mxu0 %v1095_v23  ;;  %1036 = vmatprep.mubr.msk.bf16.mxu0 %vm1120_vm0, %v1119_v1 }
  0x1e   : > { %1030 = vmatprep.subr.bf16.mxu0 %v1119_v1  ;;  %1025 = vmatmul.mubr.msk.bf16.vlgmr.msra.gmra.mxu1 %vm378_vm1, %v334_v28 }
  0x1f   : > { %1048 = vmatprep.mubr.msk.bf16.mxu1 %vm1120_vm0, %v1119_v1  ;;  %1041 = vmatpush3.bf16.msra.mxu1 %v1099_v32 }
  0x20   : > { %1042 = vmatprep.subr.bf16.mxu1 %v1119_v1 }
  0x21   : > { %1031 = vmatpush3.bf16.msra.mxu0 %v1096_v27 }
  0x22   : > { %1032 = vmatprep.subr.bf16.mxu0 %v1119_v1 }
  0x23   : > { %1043 = vmatpush3.bf16.msra.mxu1 %v1100_v33 }
  0x24   : > { %1044 = vmatprep.subr.bf16.mxu1 %v1119_v1 }
  0x25   : > { %1033 = vmatpush3.bf16.msra.mxu0 %v1097_v29 }
  0x26   : > { %1034 = vmatprep.subr.bf16.mxu0 %v1119_v1 }
  0x27   : > { %1045 = vmatpush3.bf16.msra.mxu1 %v1102_v35 }
  0x28   : > { %1046 = vmatprep.subr.bf16.mxu1 %v1119_v1 }
  0x29   : > { %1035 = vmatpush3.bf16.msra.mxu0 %v1098_v30 }
  0x2a   : > { %1052 = vmatprep.subr.bf16.mxu0 %v1119_v1 }
  0x2b   : > { %1047 = vmatpush3.bf16.msra.mxu1 %v1104_v37 }
  0x2c   : > { %1037 = vmatmul.mubr.msk.bf16.vlgmr.msra.gmra.mxu0 %vm378_vm1, %v336_v31  ;;  %1064 = vmatprep.subr.bf16.mxu1 %v1119_v1 }
  0x2d   : > { %1060 = vmatprep.mubr.msk.bf16.mxu0 %vm1120_vm0, %v1119_v1  ;;  %1053 = vmatpush3.bf16.msra.mxu0 %v1101_v34 }
  0x2e   : > { %1054 = vmatprep.subr.bf16.mxu0 %v1119_v1 }
  0x31   : > { %1055 = vmatpush3.bf16.msra.mxu0 %v1103_v36 }
  0x32   : > { %1056 = vmatprep.subr.bf16.mxu0 %v1119_v1 }
  0x35   : > { %1057 = vmatpush3.bf16.msra.mxu0 %v1105_v38 }
  0x36   : > { %1058 = vmatprep.subr.bf16.mxu0 %v1119_v1 }
  0x39   : > { %1059 = vmatpush3.bf16.msra.mxu0 %v1106_v39 }
  0xdc   : > { %v416_v40 = vpop.f32.mrf.mxu0 }
  0xde   : > { %v1014_v41 = vpop.f32.mrf.mxu0  ;;  %v483_v42 = vpop.f32.mrf.mxu1 }
  0xdf   : > { %v484_v48 = vadd.f32 %v483_v42, %v416_v40 }
  0xe0   : > { %v419_v43 = vpop.f32.mrf.mxu0  ;;  %v1026_v45 = vpop.f32.mrf.mxu1 }
  0xe2   : > { %v1015_v44 = vpop.f32.mrf.mxu0  ;;  %v486_v46 = vpop.f32.mrf.mxu1 }
  0xe4   : > { %v1027_v47 = vpop.f32.mrf.mxu1 }
  0xec   : > { %v559_v50 = vpop.f32.mrf.mxu0 }
  0xed   : > { %v565_v51 = vadd.f32 %v559_v50, %v484_v48 }
  0xee   : > { %v1038_v52 = vpop.f32.mrf.mxu0 }
  0xef   : > { %v570_v54 = vmul.f32 %v937_v49, %v565_v51 }
  0xf0   : > { %v562_v55 = vpop.f32.mrf.mxu0 }
  0xf1   : > { %v575_v56 = vadd.f32 %v938_v53, %v570_v54 }
  0xf2   : > { %v1039_v57 = vpop.f32.mrf.mxu0 }
  0xf3   : > { %v576_v58 = vmax.f32 %v575_v56, 0.0  ;;  %826 = vrot.lane.b32.xlu0 %v575_v56, %s1121_s16 }
  0xf5   : > { %v577_v60 = vpack.c.bf16 %v576_v58, %v576_v58  ;;  %v578_v61 = vrot.slane %v576_v58, 7  ;;  %v581_v3 = vrot.slane %v576_v58, 1 }
  0xf7   : > { %v579_v62 = vsel %vm1227_vm2, %v578_v61, 0.0  ;;  %1049 = vmatmul.mubr.msk.bf16.vlgmr.msra.gmra.mxu1 %vm378_vm1, %v577_v60  ;;  %v584_v5 = vsel %vm313_vm3, %v581_v3, 0.0 }
  0xf8   : > { %v580_v63 = vpack.c.bf16 %v579_v62, %v579_v62  ;;  %1065 = vmatpush3.bf16.msra.mxu1 %v1107_v59  ;;  %1072 = vmatprep.mubr.msk.bf16.mxu1 %vm1120_vm0, %v1119_v1  ;;  %v585_v7 = vpack.c.bf16 %v584_v5, %v584_v5 }
  0xf9   : > { %1066 = vmatprep.subr.bf16.mxu1 %v1119_v1 }
  0xfa   : > { %1061 = vmatmul.mubr.msk.bf16.vlgmr.msra.gmra.mxu0 %vm378_vm1, %v580_v63 }
  0xfc   : > { %1067 = vmatpush3.bf16.msra.mxu1 %v1108_v0 }
  0xfd   : > { %1068 = vmatprep.subr.bf16.mxu1 %v1119_v1 }
 0x100   : > { %1069 = vmatpush3.bf16.msra.mxu1 %v1109_v2 }
 0x101   : > { %1070 = vmatprep.subr.bf16.mxu1 %v1119_v1 }
 0x104   : > { %1071 = vmatpush3.bf16.msra.mxu1 %v1110_v4 }
 0x107   : > { %1073 = vmatmul.mubr.msk.bf16.vlgmr.msra.gmra.mxu1 %vm378_vm1, %v585_v7 }
 0x165   : > { %v827_v25 = vpop.permute.xlu0 %826 }
 0x1b7   : > { %v664_v8 = vpop.f32.mrf.mxu1 }
 0x1b9   : > { %v1050_v9 = vpop.f32.mrf.mxu1 }
 0x1ba   : > { %v731_v10 = vpop.f32.mrf.mxu0 }
 0x1bb   : > { %v667_v11 = vpop.f32.mrf.mxu1  ;;  %v732_v15 = vadd.f32 %v731_v10, %v664_v8 }
 0x1bc   : > { %v1062_v12 = vpop.f32.mrf.mxu0 }
 0x1bd   : > { %v1051_v6 = vpop.f32.mrf.mxu1 }
 0x1be   : > { %v734_v13 = vpop.f32.mrf.mxu0 }
 0x1c0   : > { %v1063_v14 = vpop.f32.mrf.mxu0 }
 0x1c7   : > { %v807_v1 = vpop.f32.mrf.mxu1 }
 0x1c8   : > { %v813_v17 = vadd.f32 %v807_v1, %v732_v15 }
 0x1c9   : > { %v1074_v19 = vpop.f32.mrf.mxu1 }
 0x1ca   : > { %v818_v20 = vmul.f32 %v970_v16, %v813_v17 }
 0x1cb   : > { %v810_v21 = vpop.f32.mrf.mxu1 }
 0x1cc   : > { %v823_v22 = vadd.f32 %v971_v18, %v818_v20 }
 0x1cd   : > { %v1075_v23 = vpop.f32.mrf.mxu1 }
 0x1ce   : > { %v824_v24 = vmax.f32 %v823_v22, 0.0 }
 0x1d0   : > { %v829_v26 = vadd.f32 %v827_v25, %v824_v24 }
 0x1d2   : > { %830 = vst.msk [vmem:[%s290_s9] sm:$0xff] %vm378_vm1, %v829_v26 }
 0x1d3 PF: > { %s17_s24 = sadd.s32 1, %s1117_s24  }
 0x1d4   : > { %p14_p4 = scmp.ge.s32.totalorder %s17_s24, 4  }
 0x1d6   :  { %16 = sbr.rel (!%p14_p4) target bundleno = 1 (0x1), region = 85 }

</bundles_post_ra>
